<compile_context>
chip_gen: v7x
topology: tpu7x:2x2x1
jax: 0.10.0
libtpu: 0.0.40
codegen_flags: <defaults>
</compile_context>

<pallas_src>
import numpy as np
import jax
import jax.numpy as jnp
from jax.experimental import pallas as pl
from jax.experimental.pallas import tpu as pltpu

INPUT_SIZE = 64
HIDDEN = 32
OUT = 2
OUT_PAD = 8            # padded output rows (sublane-aligned, transposed layout)
DEFAULT_TM = 4096      # max batch-tile rows
MATMUL_DTYPE = jnp.bfloat16


def _round_up(n, m):
    return ((n + m - 1) // m) * m


def _cdiv(a, b):
    return -(-a // b)


def _mlp_kernel(x_ref, w1_ref, b1_ref, wh_ref, bh_ref, w5_ref, b5_ref, o_ref):
    """One (TM, 64) batch tile through the whole fused MLP."""
    # In-kernel f32 -> bf16 cast of the streamed activations (VPU work, free in
    # this memory-bound regime); accumulation stays f32.
    x = x_ref[...].astype(MATMUL_DTYPE)                       # [TM, 64]

    # Layer 1: 64 -> 32
    h = jnp.dot(x, w1_ref[...], preferred_element_type=jnp.float32) + b1_ref[...]
    h = jnp.maximum(h, 0.0)

    # Layers 2-4: 32 -> 32 (statically unrolled over the packed weight stack)
    for j in range(3):
        h = jnp.dot(h.astype(wh_ref.dtype), wh_ref[j],
                    preferred_element_type=jnp.float32) + bh_ref[j]
        h = jnp.maximum(h, 0.0)

    # Layer 5, computed transposed: (OUT_PAD, HIDDEN) . (TM, HIDDEN)^T
    # -> (OUT_PAD, TM).  Rows 2..7 of w5/b5 are zero padding.  Bias + sigmoid
    # run on only OUT_PAD x TM elements and the store is a lane-dense
    # (8, TM) f32 slab (32 B written per batch row).
    y = jax.lax.dot_general(
        w5_ref[...], h.astype(w5_ref.dtype),
        dimension_numbers=(((1,), (1,)), ((), ())),
        preferred_element_type=jnp.float32) + b5_ref[...]
    o_ref[...] = jax.nn.sigmoid(y).astype(o_ref.dtype)


def _pack_params(params, dtype=MATMUL_DTYPE):
    """Pack the 10 tiny per-layer tensors into 6 lane-aligned slabs."""
    w1 = params["w1"].astype(dtype)                                   # [64, 32]
    b1 = params["b1"].astype(jnp.float32)                             # [1, 32]
    wh = jnp.stack([params["w2"], params["w3"], params["w4"]]
                   ).astype(dtype)                                    # [3, 32, 32]
    bh = jnp.stack([params["b2"], params["b3"], params["b4"]]
                   ).astype(jnp.float32)                              # [3, 1, 32]
    # Last layer stored transposed ([out, in]) and zero-padded 2 -> 8 rows.
    w5p = jnp.zeros((OUT_PAD, HIDDEN), dtype).at[:OUT, :].set(
        params["w5"].T.astype(dtype))                                 # [8, 32]
    b5p = jnp.zeros((OUT_PAD, 1), jnp.float32).at[:OUT, :].set(
        params["b5"].T.astype(jnp.float32))                           # [8, 1]
    return w1, b1, wh, bh, w5p, b5p


def linear_generator_forward(x, params, *, tm=DEFAULT_TM):
    """x: [B, 64] float32. Returns [B, 2] float32 (sigmoid outputs)."""
    B = x.shape[0]

    # ---- balanced batch tiling ----
    tm_max = max(8, tm)
    n_tiles = max(1, _cdiv(B, tm_max))
    if n_tiles == 1 and B >= 1024:
        n_tiles = 2                               # v7x: keep both TensorCores busy
    if n_tiles == 1:
        TM = _round_up(B, 8)                      # single full-dim tile, minimal pad
    else:
        TM = _round_up(_cdiv(B, n_tiles), 128)    # lane/sublane aligned tiles
    Bp = n_tiles * TM
    if Bp != B:
        x = jnp.pad(x, ((0, Bp - B), (0, 0)))     # x stays f32; cast happens in-kernel

    w1, b1, wh, bh, w5p, b5p = _pack_params(params)

    param_bytes = sum(int(np.prod(a.shape)) * a.dtype.itemsize
                      for a in (w1, b1, wh, bh, w5p, b5p))
    cost = pl.CostEstimate(
        flops=2 * Bp * (INPUT_SIZE * HIDDEN + 3 * HIDDEN * HIDDEN + HIDDEN * OUT_PAD),
        transcendentals=Bp * OUT_PAD,
        bytes_accessed=Bp * INPUT_SIZE * 4 + Bp * OUT_PAD * 4 + param_bytes,
    )

    out = pl.pallas_call(
        _mlp_kernel,
        out_shape=jax.ShapeDtypeStruct((OUT_PAD, Bp), jnp.float32),
        grid=(n_tiles,),
        in_specs=[
            pl.BlockSpec((TM, INPUT_SIZE), lambda i: (i, 0)),         # x: streamed f32
            pl.BlockSpec((INPUT_SIZE, HIDDEN), lambda i: (0, 0)),     # w1: VMEM-resident
            pl.BlockSpec((1, HIDDEN), lambda i: (0, 0)),              # b1
            pl.BlockSpec((3, HIDDEN, HIDDEN), lambda i: (0, 0, 0)),   # w2..w4 stack
            pl.BlockSpec((3, 1, HIDDEN), lambda i: (0, 0, 0)),        # b2..b4 stack
            pl.BlockSpec((OUT_PAD, HIDDEN), lambda i: (0, 0)),        # w5 (padded, transposed)
            pl.BlockSpec((OUT_PAD, 1), lambda i: (0, 0)),             # b5 (padded, transposed)
        ],
        out_specs=pl.BlockSpec((OUT_PAD, TM), lambda i: (0, i)),      # transposed output
        compiler_params=pltpu.CompilerParams(
            dimension_semantics=("parallel",),
            vmem_limit_bytes=32 * 1024 * 1024),
        cost_estimate=cost,
    )(x, w1, b1, wh, bh, w5p, b5p)

    # Tiny epilogue: slice the 2 valid output rows and restore [B, 2] layout.
    return out[:OUT, :B].T


def init_params(key):
    """Matches torch `weights_init`: W ~ Normal(0, 1/sqrt(out_features)), b = 0.
    Weights stored transposed as [in, out] so the kernel does y = x @ W + b."""
    dims = [(INPUT_SIZE, HIDDEN), (HIDDEN, HIDDEN), (HIDDEN, HIDDEN),
            (HIDDEN, HIDDEN), (HIDDEN, OUT)]
    params = {}
    keys = jax.random.split(key, len(dims))
    for i, ((fan_in, fan_out), k) in enumerate(zip(dims, keys), start=1):
        std = 1.0 / np.sqrt(fan_out)  # torch: 1/sqrt(weight.shape[0]) = 1/sqrt(out)
        w_t = (jax.random.normal(k, (fan_out, fan_in), dtype=jnp.float32) * std).T
        params[f"w{i}"] = jnp.asarray(w_t)
        params[f"b{i}"] = jnp.zeros((1, fan_out), dtype=jnp.float32)
    return params


def _reference_forward(x, params):
    """Pure-JAX f32 reference."""
    h = x
    for i in range(1, 5):
        h = jnp.maximum(h @ params[f"w{i}"] + params[f"b{i}"], 0.0)
    return jax.nn.sigmoid(h @ params["w5"] + params["b5"])


if __name__ == "__main__":
    key = jax.random.PRNGKey(0)
    k_param, k_x1, k_x2, k_x3 = jax.random.split(key, 4)
    params = init_params(k_param)

    # (B, expected tiling):
    #   8    -> single tiny full-dim tile
    #   600  -> single tile, no batch padding (balanced tiling)
    #   2085 -> 2 tiles (v7x dual-TensorCore path) with modest padding
    for B, kx in ((8, k_x1), (600, k_x2), (2085, k_x3)):
        x = jax.random.normal(kx, (B, INPUT_SIZE), dtype=jnp.float32)
        out = jax.block_until_ready(linear_generator_forward(x, params))
        ref = _reference_forward(x, params)
        assert out.shape == (B, OUT), out.shape
        np.testing.assert_allclose(np.asarray(out), np.asarray(ref),
                                   rtol=5e-2, atol=2e-2)  # bf16 matmul inputs

    print("KERNEL_OK")
</pallas_src>

<mosaic_0001>
module attributes {stable_mosaic.version = 11 : i64} {
  func.func @_mlp_kernel(%arg0: i32, %arg1: memref<8x64xf32, #tpu.memory_space<vmem>>, %arg2: memref<64x32xbf16, #tpu.memory_space<vmem>>, %arg3: memref<1x32xf32, #tpu.memory_space<vmem>>, %arg4: memref<3x32x32xbf16, #tpu.memory_space<vmem>>, %arg5: memref<3x1x32xf32, #tpu.memory_space<vmem>>, %arg6: memref<8x32xbf16, #tpu.memory_space<vmem>>, %arg7: memref<8x1xf32, #tpu.memory_space<vmem>>, %arg8: memref<8x8xf32, #tpu.memory_space<vmem>>) attributes {dimension_semantics = [#tpu.dimension_semantics<parallel>], iteration_bounds = array<i64: 1>, scalar_prefetch = 0 : i64, scratch_operands = 0 : i64, tpu.core_type = #tpu.core_type<tc>, window_params = [{transform_indices = @transform_0, window_bounds = array<i64: 8, 64>}, {pipeline_mode = #tpu.pipeline_mode<synchronous>, transform_indices = @transform_1, window_bounds = array<i64: 64, 32>}, {pipeline_mode = #tpu.pipeline_mode<synchronous>, transform_indices = @transform_2, window_bounds = array<i64: 1, 32>}, {pipeline_mode = #tpu.pipeline_mode<synchronous>, transform_indices = @transform_3, window_bounds = array<i64: 3, 32, 32>}, {pipeline_mode = #tpu.pipeline_mode<synchronous>, transform_indices = @transform_4, window_bounds = array<i64: 3, 1, 32>}, {pipeline_mode = #tpu.pipeline_mode<synchronous>, transform_indices = @transform_5, window_bounds = array<i64: 8, 32>}, {pipeline_mode = #tpu.pipeline_mode<synchronous>, transform_indices = @transform_6, window_bounds = array<i64: 8, 1>}, {transform_indices = @transform_7, window_bounds = array<i64: 8, 8>}]} {
    %c0 = arith.constant 0 : index
    %c0_0 = arith.constant 0 : index
    %0 = vector.load %arg1[%c0, %c0_0] : memref<8x64xf32, #tpu.memory_space<vmem>>, vector<8x64xf32>
    %1 = arith.truncf %0 : vector<8x64xf32> to vector<8x64xbf16>
    %c0_1 = arith.constant 0 : index
    %c0_2 = arith.constant 0 : index
    %2 = vector.load %arg2[%c0_1, %c0_2] : memref<64x32xbf16, #tpu.memory_space<vmem>>, vector<64x32xbf16>
    %cst = arith.constant dense<0.000000e+00> : vector<8x32xf32>
    %3 = tpu.matmul %1, %2, %cst {dimension_numbers = #tpu.dot_dimension_numbers<[1], [0], [0], [1], [0, 0, 1, 1], [], []>} : vector<8x64xbf16>, vector<64x32xbf16>, vector<8x32xf32> -> vector<8x32xf32>
    %c0_3 = arith.constant 0 : index
    %c0_4 = arith.constant 0 : index
    %4 = vector.load %arg3[%c0_3, %c0_4] : memref<1x32xf32, #tpu.memory_space<vmem>>, vector<1x32xf32>
    %5 = vector.broadcast %4 : vector<1x32xf32> to vector<8x32xf32>
    %6 = arith.addf %3, %5 : vector<8x32xf32>
    %cst_5 = arith.constant 0.000000e+00 : f32
    %7 = vector.broadcast %cst_5 : f32 to vector<8x32xf32>
    %8 = arith.maximumf %6, %7 : vector<8x32xf32>
    %9 = arith.truncf %8 : vector<8x32xf32> to vector<8x32xbf16>
    %c0_6 = arith.constant 0 : index
    %c0_7 = arith.constant 0 : index
    %c0_8 = arith.constant 0 : index
    %10 = vector.load %arg4[%c0_6, %c0_7, %c0_8] : memref<3x32x32xbf16, #tpu.memory_space<vmem>>, vector<1x32x32xbf16>
    %11 = vector.shape_cast %10 : vector<1x32x32xbf16> to vector<32x32xbf16>
    %cst_9 = arith.constant dense<0.000000e+00> : vector<8x32xf32>
    %12 = tpu.matmul %9, %11, %cst_9 {dimension_numbers = #tpu.dot_dimension_numbers<[1], [0], [0], [1], [0, 0, 1, 1], [], []>} : vector<8x32xbf16>, vector<32x32xbf16>, vector<8x32xf32> -> vector<8x32xf32>
    %c0_10 = arith.constant 0 : index
    %c0_11 = arith.constant 0 : index
    %c0_12 = arith.constant 0 : index
    %13 = vector.load %arg5[%c0_10, %c0_11, %c0_12] : memref<3x1x32xf32, #tpu.memory_space<vmem>>, vector<1x1x32xf32>
    %14 = vector.shape_cast %13 : vector<1x1x32xf32> to vector<1x32xf32>
    %15 = vector.broadcast %14 : vector<1x32xf32> to vector<8x32xf32>
    %16 = arith.addf %12, %15 : vector<8x32xf32>
    %cst_13 = arith.constant 0.000000e+00 : f32
    %17 = vector.broadcast %cst_13 : f32 to vector<8x32xf32>
    %18 = arith.maximumf %16, %17 : vector<8x32xf32>
    %19 = arith.truncf %18 : vector<8x32xf32> to vector<8x32xbf16>
    %c1 = arith.constant 1 : index
    %c0_14 = arith.constant 0 : index
    %c0_15 = arith.constant 0 : index
    %20 = vector.load %arg4[%c1, %c0_14, %c0_15] : memref<3x32x32xbf16, #tpu.memory_space<vmem>>, vector<1x32x32xbf16>
    %21 = vector.shape_cast %20 : vector<1x32x32xbf16> to vector<32x32xbf16>
    %cst_16 = arith.constant dense<0.000000e+00> : vector<8x32xf32>
    %22 = tpu.matmul %19, %21, %cst_16 {dimension_numbers = #tpu.dot_dimension_numbers<[1], [0], [0], [1], [0, 0, 1, 1], [], []>} : vector<8x32xbf16>, vector<32x32xbf16>, vector<8x32xf32> -> vector<8x32xf32>
    %c1_17 = arith.constant 1 : index
    %c0_18 = arith.constant 0 : index
    %c0_19 = arith.constant 0 : index
    %23 = vector.load %arg5[%c1_17, %c0_18, %c0_19] : memref<3x1x32xf32, #tpu.memory_space<vmem>>, vector<1x1x32xf32>
    %24 = vector.shape_cast %23 : vector<1x1x32xf32> to vector<1x32xf32>
    %25 = vector.broadcast %24 : vector<1x32xf32> to vector<8x32xf32>
    %26 = arith.addf %22, %25 : vector<8x32xf32>
    %cst_20 = arith.constant 0.000000e+00 : f32
    %27 = vector.broadcast %cst_20 : f32 to vector<8x32xf32>
    %28 = arith.maximumf %26, %27 : vector<8x32xf32>
    %29 = arith.truncf %28 : vector<8x32xf32> to vector<8x32xbf16>
    %c2 = arith.constant 2 : index
    %c0_21 = arith.constant 0 : index
    %c0_22 = arith.constant 0 : index
    %30 = vector.load %arg4[%c2, %c0_21, %c0_22] : memref<3x32x32xbf16, #tpu.memory_space<vmem>>, vector<1x32x32xbf16>
    %31 = vector.shape_cast %30 : vector<1x32x32xbf16> to vector<32x32xbf16>
    %cst_23 = arith.constant dense<0.000000e+00> : vector<8x32xf32>
    %32 = tpu.matmul %29, %31, %cst_23 {dimension_numbers = #tpu.dot_dimension_numbers<[1], [0], [0], [1], [0, 0, 1, 1], [], []>} : vector<8x32xbf16>, vector<32x32xbf16>, vector<8x32xf32> -> vector<8x32xf32>
    %c2_24 = arith.constant 2 : index
    %c0_25 = arith.constant 0 : index
    %c0_26 = arith.constant 0 : index
    %33 = vector.load %arg5[%c2_24, %c0_25, %c0_26] : memref<3x1x32xf32, #tpu.memory_space<vmem>>, vector<1x1x32xf32>
    %34 = vector.shape_cast %33 : vector<1x1x32xf32> to vector<1x32xf32>
    %35 = vector.broadcast %34 : vector<1x32xf32> to vector<8x32xf32>
    %36 = arith.addf %32, %35 : vector<8x32xf32>
    %cst_27 = arith.constant 0.000000e+00 : f32
    %37 = vector.broadcast %cst_27 : f32 to vector<8x32xf32>
    %38 = arith.maximumf %36, %37 : vector<8x32xf32>
    %c0_28 = arith.constant 0 : index
    %c0_29 = arith.constant 0 : index
    %39 = vector.load %arg6[%c0_28, %c0_29] : memref<8x32xbf16, #tpu.memory_space<vmem>>, vector<8x32xbf16>
    %40 = arith.truncf %38 : vector<8x32xf32> to vector<8x32xbf16>
    %cst_30 = arith.constant dense<0.000000e+00> : vector<8x8xf32>
    %41 = tpu.matmul %39, %40, %cst_30 {dimension_numbers = #tpu.dot_dimension_numbers<[1], [1], [0], [0], [0, 0, 1, 0], [], []>} : vector<8x32xbf16>, vector<8x32xbf16>, vector<8x8xf32> -> vector<8x8xf32>
    %c0_31 = arith.constant 0 : index
    %c0_32 = arith.constant 0 : index
    %42 = vector.load %arg7[%c0_31, %c0_32] : memref<8x1xf32, #tpu.memory_space<vmem>>, vector<8x1xf32>
    %43 = vector.broadcast %42 : vector<8x1xf32> to vector<8x8xf32>
    %44 = arith.addf %41, %43 : vector<8x8xf32>
    %45 = arith.negf %44 : vector<8x8xf32>
    %46 = math.exp %45 : vector<8x8xf32>
    %cst_33 = arith.constant 1.000000e+00 : f32
    %47 = vector.broadcast %cst_33 : f32 to vector<8x8xf32>
    %48 = arith.addf %47, %46 : vector<8x8xf32>
    %49 = arith.divf %47, %48 : vector<8x8xf32>
    %c0_34 = arith.constant 0 : index
    %c0_35 = arith.constant 0 : index
    %50 = vector.load %arg8[%c0_34, %c0_35] : memref<8x8xf32, #tpu.memory_space<vmem>>, vector<8x8xf32>
    tpu.vector_store %arg8[%c0_34, %c0_35], %49 {strides = array<i32>} : memref<8x8xf32, #tpu.memory_space<vmem>>, vector<8x8xf32>,
    return
  }
  func.func @transform_0(%arg0: i32) -> (i32, i32) {
    %c0_i32 = arith.constant 0 : i32
    %c0_i32_0 = arith.constant 0 : i32
    return %arg0, %c0_i32 : i32, i32
  }
  func.func @transform_1(%arg0: i32) -> (i32, i32) {
    %c0_i32 = arith.constant 0 : i32
    %c0_i32_0 = arith.constant 0 : i32
    %c0_i32_1 = arith.constant 0 : i32
    return %c0_i32, %c0_i32_0 : i32, i32
  }
  func.func @transform_2(%arg0: i32) -> (i32, i32) {
    %c0_i32 = arith.constant 0 : i32
    %c0_i32_0 = arith.constant 0 : i32
    %c0_i32_1 = arith.constant 0 : i32
    return %c0_i32, %c0_i32_0 : i32, i32
  }
  func.func @transform_3(%arg0: i32) -> (i32, i32, i32) {
    %c0_i32 = arith.constant 0 : i32
    %c0_i32_0 = arith.constant 0 : i32
    %c0_i32_1 = arith.constant 0 : i32
    %c0_i32_2 = arith.constant 0 : i32
    return %c0_i32, %c0_i32_0, %c0_i32_1 : i32, i32, i32
  }
  func.func @transform_4(%arg0: i32) -> (i32, i32, i32) {
    %c0_i32 = arith.constant 0 : i32
    %c0_i32_0 = arith.constant 0 : i32
    %c0_i32_1 = arith.constant 0 : i32
    %c0_i32_2 = arith.constant 0 : i32
    return %c0_i32, %c0_i32_0, %c0_i32_1 : i32, i32, i32
  }
  func.func @transform_5(%arg0: i32) -> (i32, i32) {
    %c0_i32 = arith.constant 0 : i32
    %c0_i32_0 = arith.constant 0 : i32
    %c0_i32_1 = arith.constant 0 : i32
    return %c0_i32, %c0_i32_0 : i32, i32
  }
  func.func @transform_6(%arg0: i32) -> (i32, i32) {
    %c0_i32 = arith.constant 0 : i32
    %c0_i32_0 = arith.constant 0 : i32
    %c0_i32_1 = arith.constant 0 : i32
    return %c0_i32, %c0_i32_0 : i32, i32
  }
  func.func @transform_7(%arg0: i32) -> (i32, i32) {
    %c0_i32 = arith.constant 0 : i32
    %c0_i32_0 = arith.constant 0 : i32
    return %c0_i32, %arg0 : i32, i32
  }
}

</mosaic_0001>

<bundles_post_ra>
// kernel: tpu_custom_call.1
= control target key start
LH: loop header
LB: loop body
LE: loop exit
PB: predicated region body
PF: predicated region fallthrough
CT: control target
= control target key end

     0   :  { %v530_v1 = vmov 0.0   ;;  %vm531_vm0 = vmmov 0   ;;  %s647_s0 = inlined_call_operand.vmem [shape: f32[8,64], index: 0, kind: input, shape index: {}]   ;;  %s648_s1 = inlined_call_operand.vmem [shape: bf16[64,32], index: 1, kind: input, shape index: {}]   ;;  %s649_s2 = inlined_call_operand.vmem [shape: f32[1,32], index: 2, kind: input, shape index: {}]   ;;  %s650_s3 = inlined_call_operand.vmem [shape: bf16[3,32,32], index: 3, kind: input, shape index: {}]   ;;  %s651_s4 = inlined_call_operand.vmem [shape: f32[3,1,32], index: 4, kind: input, shape index: {}]   ;;  %s652_s5 = inlined_call_operand.vmem [shape: bf16[8,32], index: 5, kind: input, shape index: {}]   ;;  %s653_s6 = inlined_call_operand.vmem [shape: f32[8,1], index: 6, kind: input, shape index: {}]   ;;  %s654_s7 = inlined_call_operand.hbm [shape: f32[8,8], index: 7, kind: output, shape index: {}]  }
   0x1   :  { %v492_v0 = vld [vmem:[%s648_s1] sm:$0xff]   ;;  %445 = vmatprep.subr.bf16.mxu0 %v530_v1  ;;  %457 = vmatprep.subr.bf16.mxu1 %v530_v1  ;;  %v493_v2 = vld [vmem:[%s648_s1 + $0x8] sm:$0xff]   ;;  %v494_v3 = vld [vmem:[%s648_s1 + $0x10] sm:$0xff]  }
   0x2   :  { %446 = vmatpush3.bf16.msra.mxu0 %v492_v0  ;;  %453 = vmatprep.mubr.msk.bf16.mxu0 %vm531_vm0, %v530_v1 }
   0x3   :  { %447 = vmatprep.subr.bf16.mxu0 %v530_v1  ;;  %461 = vmatprep.mubr.msk.bf16.mxu1 %vm531_vm0, %v530_v1 }
   0x6   :  { %448 = vmatpush3.bf16.msra.mxu0 %v493_v2 }
   0x7   :  { %449 = vmatprep.subr.bf16.mxu0 %v530_v1 }
   0x8   :  { %12 = vsyncpa [#allocation3], 0  ;;  %v495_v4 = vld [vmem:[%s648_s1 + $0x18] sm:$0xff]   ;;  %v28_v5 = vld [vmem:[%s647_s0] sm:$0xff]  ;;  %vm69_vm1 = vcmask 523264   ;;  %vm138_vm2 = vcmask 261120  }
   0x9   :  { %v29_v6 = vpack.c.bf16 %v28_v5, %v28_v5  ;;  %v496_v7 = vld [vmem:[%s650_s3] sm:$0xff]   ;;  %v497_v8 = vld [vmem:[%s650_s3 + $0x8] sm:$0xff]   ;;  %v498_v17 = vld [vmem:[%s650_s3 + $0x10] sm:$0xff]   ;;  %v532_v38 = vmov 0   ;;  %vm383_vm3 = vcmask 64512  }
   0xa   :  { %450 = vmatpush3.bf16.msra.mxu0 %v494_v3  ;;  %458 = vmatpush3.bf16.msra.mxu1 %v496_v7  ;;  %v399_v9 = vld [vmem:[%s649_s2] ss:$0 sm:$0xff]  ;;  %v499_v18 = vld [vmem:[%s650_s3 + $0x18] sm:$0xff]   ;;  %v501_v28 = vld [vmem:[%s650_s3 + $0x28] sm:$0xff]  }
   0xb   :  { %451 = vmatprep.subr.bf16.mxu0 %v530_v1  ;;  %459 = vmatprep.subr.bf16.mxu1 %v530_v1  ;;  %v405_v19 = vld [vmem:[%s651_s4] ss:$0 sm:$0xff]  ;;  %v414_v29 = vld [vmem:[%s651_s4 + $0x1] ss:$0 sm:$0xff]  ;;  %v423_v39 = vld [vmem:[%s651_s4 + $0x2] ss:$0 sm:$0xff] }
   0xc   :  { %v500_v27 = vld [vmem:[%s650_s3 + $0x20] sm:$0xff]   ;;  %491 = vset.pattern.permute.xlu0 %v532_v38  ;;  %s533_s4 = smov [#allocation2]  }
   0xd   :  { %v325_v37 = vld [vmem:[%s653_s6] sm:$0xff]  ;;  %s391_s6 = sshll.u32 %s533_s4, 4  ;;  %s392_s6 = int_to_ptr.vmem [resolvable:$true] %s391_s6 }
   0xe   :  { %452 = vmatpush3.bf16.msra.mxu0 %v495_v4  ;;  %460 = vmatpush3.bf16.msra.mxu1 %v497_v8  ;;  %v323_v48 = vld [vmem:[%s652_s5] sm:$0xf]  ;;  %s506_s5 = scalar_lea.vmem %s392_s6, 128  ;;  %p511_p1 = scmp.lt.s32.totalorder %s392_s6, %s392_s6 }
   0xf   :  { %473 = vmatprep.subr.bf16.mxu0 %v530_v1  ;;  %465 = vmatprep.subr.bf16.mxu1 %v530_v1  ;;  %p507_p0 = scmp.ne.s32.totalorder %s392_s6, %s506_s5  ;;  %p512_p2 = scmp.lt.s32.totalorder %s506_s5, %s506_s5 }
  0x10   :  { %328 = vperm.xlu0 %491, %v325_v37  }
  0x11   :  { %454 = vmatmul.mubr.msk.bf16.vlgmr.msra.gmra.mrb[0].mxu0 %vm69_vm1, %v29_v6  ;;  %p513_p3 = por %p512_p2, %p511_p1 }
  0x12   :  { %477 = vmatprep.mubr.msk.bf16.mxu0 %vm531_vm0, %v530_v1  ;;  %474 = vmatpush3.bf16.msra.mxu0 %v500_v27 }
  0x13   :  { %475 = vmatprep.subr.bf16.mxu0 %v530_v1  ;;  %p514_p4 = pnand %p513_p3, %p507_p0 }
  0x16   :  { %476 = vmatpush3.bf16.msra.mxu0 %v501_v28 }
  0x8f   :  { %v329_v49 = vpop.permute.xlu0 %328 }
  0xe4   :  { %v107_v10 = vpop.f32.mrb[0].mxu0 }
  0xe5   :  { %v108_v11 = vadd.f32 %v399_v9, %v107_v10  ;;  %v455_v12 = vpop.f32.mrb[1].mxu0 }
  0xe6   :  { %v110_v13 = vpop.f32.mrb[2].mxu0 }
  0xe7   :  { %v113_v14 = vmax.f32 %v108_v11, 0.0  ;;  %v456_v15 = vpop.f32.mrb[3].mxu0 }
  0xe9   :  { %v114_v16 = vpack.c.bf16 %v113_v14, %v113_v14 }
  0xeb   :  { %462 = vmatmul.mubr.msk.bf16.vlgmr.msra.gmra.mrb[0].mxu1 %vm138_vm2, %v114_v16 }
  0xec   :  { %469 = vmatprep.mubr.msk.bf16.mxu1 %vm531_vm0, %v530_v1  ;;  %466 = vmatpush3.bf16.msra.mxu1 %v498_v17 }
  0xed   :  { %467 = vmatprep.subr.bf16.mxu1 %v530_v1 }
  0xf0   :  { %468 = vmatpush3.bf16.msra.mxu1 %v499_v18 }
  0xf1   :  { %481 = vmatprep.subr.bf16.mxu1 %v530_v1 }
 0x1be   :  { %v176_v20 = vpop.f32.mrb[0].mxu1 }
 0x1bf   :  { %v177_v21 = vadd.f32 %v405_v19, %v176_v20  ;;  %v463_v22 = vpop.f32.mrb[1].mxu1 }
 0x1c0   :  { %v179_v23 = vpop.f32.mrb[2].mxu1 }
 0x1c1   :  { %v182_v24 = vmax.f32 %v177_v21, 0.0  ;;  %v464_v25 = vpop.f32.mrb[3].mxu1 }
 0x1c3   :  { %v183_v26 = vpack.c.bf16 %v182_v24, %v182_v24 }
 0x1c5   :  { %470 = vmatmul.mubr.msk.bf16.vlgmr.msra.gmra.mrb[4].mxu1 %vm138_vm2, %v183_v26 }
 0x1c6   :  { %483 = vmatprep.mubr.msk.bf16.mxu1 %vm531_vm0, %v530_v1 }
 0x298   :  { %v246_v30 = vpop.f32.mrb[4].mxu1 }
 0x299   :  { %v247_v31 = vadd.f32 %v414_v29, %v246_v30  ;;  %v471_v32 = vpop.f32.mrb[5].mxu1 }
 0x29a   :  { %v249_v33 = vpop.f32.mrb[6].mxu1 }
 0x29b   :  { %v252_v34 = vmax.f32 %v247_v31, 0.0  ;;  %v472_v35 = vpop.f32.mrb[7].mxu1 }
 0x29d   :  { %v253_v36 = vpack.c.bf16 %v252_v34, %v252_v34 }
 0x29f   :  { %478 = vmatmul.mubr.msk.bf16.vlgmr.msra.gmra.mrb[4].mxu0 %vm138_vm2, %v253_v36 }
 0x372   :  { %v316_v40 = vpop.f32.mrb[4].mxu0 }
 0x373   :  { %v317_v41 = vadd.f32 %v423_v39, %v316_v40  ;;  %v479_v42 = vpop.f32.mrb[5].mxu0 }
 0x374   :  { %v319_v43 = vpop.f32.mrb[6].mxu0 }
 0x375   :  { %v322_v44 = vmax.f32 %v317_v41, 0.0  ;;  %v480_v45 = vpop.f32.mrb[7].mxu0 }
 0x377   :  { %v324_v46 = vpack.c.bf16 %v322_v44, %v322_v44 }
 0x379   :  { %v335_v47 = vsel %vm138_vm2, %v324_v46, 0 }
 0x37a   :  { %482 = vmatpush3.bf16.xpose.msra.mxu1 %v335_v47 }
 0x381   :  { %484 = vmatmul.mubr.msk.bf16.vlgmr.msra.gmra.mrb[8].mxu1 %vm138_vm2, %v323_v48 }
 0x454   :  { %v371_v50 = vpop.f32.mrb[8].mxu1 }
 0x455   :  { %v372_v51 = vadd.f32 %v371_v50, %v329_v49  ;;  %v485_v52 = vpop.f32.mrb[9].mxu1 }
 0x456   :  { %v374_v53 = vpop.f32.mrb[10].mxu1 }
 0x457   :  { %v428_v54 = vmul.f32 -1.442695, %v372_v51  ;;  %v486_v55 = vpop.f32.mrb[11].mxu1 }
 0x459   :  { %502 = vpow2.f32 %v428_v54 }
 0x463   :  { %v503_v56 = vpop.eup %502 }
 0x464   :  { %v380_v57 = vadd.f32 1.0, %v503_v56 }
 0x466   :  { %504 = vrcp.f32 %v380_v57 }
 0x470   :  { %v505_v58 = vpop.eup %504 }
 0x471   :  { %384 = vst.msk [vmem:[#allocation2] sm:$0xff] %vm383_vm3, %v505_v58 }
 0x472   :  { %517 = shalt.err (!%p514_p4)
}
 0x473   :  { %s518_s10 = scalar_lea.hbm %s654_s7, 128 }
 0x474   :  { %p519_p5 = scmp.ne.s32.totalorder %s654_s7, %s518_s10  ;;  %p522_p6 = scmp.lt.u32.totalorder %s518_s10, %s654_s7 }
 0x476   :  { %p524_p7 = pnand %p522_p6, %p519_p5 }
 0x478   :  { %527 = shalt.err (!%p524_p7)
}
 0x479   :  { %394 = dma.vmem_to_hbm [thread:$0]  %s392_s6, 128, %s654_s7, [#allocation3]  }
 0x47a   :  { %528 = dma.done.wait [#allocation3], 128  }
 0x47b   :  { %529 = vsyncadd [#allocation3], 4294967168 }
 0x47c   :  { %398 = vsyncpa [#allocation3], 1 }

</bundles_post_ra>
